<compile_context>
chip_gen: v6e
topology: v6e:2x2x1
jax: 0.10.0
libtpu: 0.0.40
codegen_flags: <defaults>
</compile_context>

<pallas_src>
import jax
import jax.numpy as jnp
import numpy as np
from jax.experimental import pallas as pl
from jax.experimental.pallas import tpu as pltpu


def _taps_and_mask(H, W):
    """Static per-tap lane shifts and a (9, H*W) boundary mask (0/1 f32)."""
    HW = H * W
    lane = np.arange(HW)
    row, col = lane // W, lane % W
    shifts, masks = [], []
    for dy in range(3):
        for dx in range(3):
            s = (dy - 1) * W + (dx - 1)          # source offset in flat space
            shifts.append(int((-s) % HW))        # jnp.roll-style shift amount
            m = np.ones(HW, dtype=np.float32)
            if dy == 0:
                m *= (row >= 1)
            elif dy == 2:
                m *= (row <= H - 2)
            if dx == 0:
                m *= (col >= 1)
            elif dx == 2:
                m *= (col <= W - 2)
            masks.append(m)
    return shifts, jnp.asarray(np.stack(masks))  # (9, HW) f32


def _fuse_weight(w_oihw, scale):
    """(Cout,Cin,3,3) conv weight * per-Cout BN scale -> (9, Cout, Cin) bf16."""
    cout, cin = w_oihw.shape[0], w_oihw.shape[1]
    w = w_oihw.astype(jnp.float32) * scale.astype(jnp.float32)[:, None, None, None]
    w_k = jnp.transpose(w, (2, 3, 0, 1)).reshape(9, cout, cin)   # k = 3*dy + dx
    return w_k.astype(jnp.bfloat16)              # bf16 MXU operand


def _make_kernel(shifts):
    def kernel(x_ref, m_ref, w1_ref, b1_ref, w2_ref, b2_ref, o_ref):
        # x_ref : (C, HW)  f32   one image; channels on sublanes, spatial on lanes
        # m_ref : (9, HW)  f32   per-tap boundary masks (grid-invariant)
        # wX_ref: (9, C, C) bf16 per-tap weights with BN scale folded in
        # bX_ref: (C, 1)   f32   folded BN bias
        x = x_ref[...]
        masks = m_ref[...]

        def conv_bn_relu(v, w_ref, b_ref):
            acc = None
            for k, sh in enumerate(shifts):
                t = pltpu.roll(v, shift=sh, axis=1) if sh != 0 else v
                if k != 4:                       # center tap needs no mask
                    t = t * masks[k:k + 1, :]
                p = jnp.dot(w_ref[k], t.astype(jnp.bfloat16),
                            preferred_element_type=jnp.float32)
                acc = p if acc is None else acc + p
            return jnp.maximum(acc + b_ref[...], 0.0)   # bias + ReLU in f32

        y1 = conv_bn_relu(x, w1_ref, b1_ref)
        y2 = conv_bn_relu(y1, w2_ref, b2_ref)
        # Module: x + relu(bn2(conv2(relu(bn1(conv1(x)))))) -- no ReLU after add.
        o_ref[...] = (x + y2).astype(o_ref.dtype)

    return kernel


@jax.jit
def residual_block(x_nchw, w1_oihw, scale1, bias1, w2_oihw, scale2, bias2):
    """x_nchw: (N, C, H, W) float32. Returns (N, C, H, W) float32."""
    N, C, H, W = x_nchw.shape
    HW = H * W

    # (N, C, H, W) -> (C, N*HW): batch lives on the lane axis (lane-dense).
    x2d = jnp.transpose(x_nchw, (1, 0, 2, 3)).reshape(C, N * HW)

    w1f = _fuse_weight(w1_oihw, scale1)          # (9, C, C) bf16
    w2f = _fuse_weight(w2_oihw, scale2)
    b1r = bias1.astype(jnp.float32).reshape(C, 1)
    b2r = bias2.astype(jnp.float32).reshape(C, 1)
    shifts, mask = _taps_and_mask(H, W)

    out2d = pl.pallas_call(
        _make_kernel(shifts),
        out_shape=jax.ShapeDtypeStruct((C, N * HW), x_nchw.dtype),
        grid_spec=pltpu.PrefetchScalarGridSpec(
            num_scalar_prefetch=0,
            grid=(N,),                           # one image per grid step
            in_specs=[
                pl.BlockSpec((C, HW), lambda i: (0, i)),
                pl.BlockSpec((9, HW), lambda i: (0, 0)),
                pl.BlockSpec((9, C, C), lambda i: (0, 0, 0)),
                pl.BlockSpec((C, 1), lambda i: (0, 0)),
                pl.BlockSpec((9, C, C), lambda i: (0, 0, 0)),
                pl.BlockSpec((C, 1), lambda i: (0, 0)),
            ],
            out_specs=pl.BlockSpec((C, HW), lambda i: (0, i)),
        ),
        compiler_params=pltpu.CompilerParams(
            dimension_semantics=("parallel",)),   # v7x: 2 TCs split the batch
    )(x2d, mask, w1f, b1r, w2f, b2r)

    return jnp.transpose(out2d.reshape(C, N, H, W), (1, 0, 2, 3))


def _reference(x, w1, s1, b1, w2, s2, b2, mxu_bf16):
    """Pure-JAX (XLA conv) reference.  mxu_bf16=True mirrors the kernel's bf16
    MXU operands (f32 accumulation); False is the exact f32 module math."""
    def conv_bn_relu(y, w, s, b):
        wf = w.astype(jnp.float32) * s[:, None, None, None]
        if mxu_bf16:
            y, wf = y.astype(jnp.bfloat16), wf.astype(jnp.bfloat16)
        y = jax.lax.conv_general_dilated(
            y, wf, window_strides=(1, 1), padding="SAME",
            dimension_numbers=("NCHW", "OIHW", "NCHW"),
            preferred_element_type=jnp.float32)
        return jnp.maximum(y + b[None, :, None, None], 0.0)
    return x + conv_bn_relu(conv_bn_relu(x, w1, s1, b1), w2, s2, b2)


if __name__ == "__main__":
    # ResidualBlock(n_in=4) on (batch=2, channels=4, spatial=16x16) NCHW input.
    N, C, H, W = 2, 4, 16, 16
    key = jax.random.PRNGKey(0)
    kx, kw1, kw2, kg1, kb1, km1, kv1, kg2, kb2, km2, kv2 = jax.random.split(key, 11)

    x = jax.random.normal(kx, (N, C, H, W), jnp.float32)

    # Conv weights (Cout, Cin, 3, 3), no bias (matches nn.Conv2d(..., bias=False)).
    w1 = jax.random.normal(kw1, (C, C, 3, 3), jnp.float32) * 0.2
    w2 = jax.random.normal(kw2, (C, C, 3, 3), jnp.float32) * 0.2

    # Deterministic BN params, folded to per-channel scale/bias (eval mode).
    eps = 1e-5
    gamma1 = 0.5 + jax.random.uniform(kg1, (C,), jnp.float32)
    beta1 = 0.1 * jax.random.normal(kb1, (C,), jnp.float32)
    mean1 = 0.1 * jax.random.normal(km1, (C,), jnp.float32)
    var1 = 0.5 + jax.random.uniform(kv1, (C,), jnp.float32)
    gamma2 = 0.5 + jax.random.uniform(kg2, (C,), jnp.float32)
    beta2 = 0.1 * jax.random.normal(kb2, (C,), jnp.float32)
    mean2 = 0.1 * jax.random.normal(km2, (C,), jnp.float32)
    var2 = 0.5 + jax.random.uniform(kv2, (C,), jnp.float32)

    scale1 = gamma1 / jnp.sqrt(var1 + eps)
    bias1 = beta1 - mean1 * scale1
    scale2 = gamma2 / jnp.sqrt(var2 + eps)
    bias2 = beta2 - mean2 * scale2

    out = residual_block(x, w1, scale1, bias1, w2, scale2, bias2)
    out = jax.block_until_ready(out)

    # Structural check: XLA conv reference with matching bf16 MXU operand
    # precision (f32 accumulation) -- tight tolerance.
    ref_bf16 = _reference(x, w1, scale1, bias1, w2, scale2, bias2, True)
    np.testing.assert_allclose(np.asarray(out), np.asarray(ref_bf16),
                               rtol=2e-3, atol=2e-3)
    # Module-fidelity check: pure-f32 module math, bf16-operand tolerance.
    ref_f32 = _reference(x, w1, scale1, bias1, w2, scale2, bias2, False)
    np.testing.assert_allclose(np.asarray(out), np.asarray(ref_f32),
                               rtol=5e-2, atol=5e-2)
    print("KERNEL_OK")
</pallas_src>

<mosaic_0001>
module attributes {stable_mosaic.version = 11 : i64} {
  func.func @kernel(%arg0: i32, %arg1: memref<4x256xf32, #tpu.memory_space<vmem>>, %arg2: memref<9x256xf32, #tpu.memory_space<vmem>>, %arg3: memref<9x4x4xbf16, #tpu.memory_space<vmem>>, %arg4: memref<4x1xf32, #tpu.memory_space<vmem>>, %arg5: memref<9x4x4xbf16, #tpu.memory_space<vmem>>, %arg6: memref<4x1xf32, #tpu.memory_space<vmem>>, %arg7: memref<4x256xf32, #tpu.memory_space<vmem>>) attributes {dimension_semantics = [#tpu.dimension_semantics<parallel>], iteration_bounds = array<i64: 2>, scalar_prefetch = 0 : i64, scratch_operands = 0 : i64, tpu.core_type = #tpu.core_type<tc>, window_params = [{transform_indices = @transform_0, window_bounds = array<i64: 4, 256>}, {pipeline_mode = #tpu.pipeline_mode<synchronous>, transform_indices = @transform_1, window_bounds = array<i64: 9, 256>}, {pipeline_mode = #tpu.pipeline_mode<synchronous>, transform_indices = @transform_2, window_bounds = array<i64: 9, 4, 4>}, {pipeline_mode = #tpu.pipeline_mode<synchronous>, transform_indices = @transform_3, window_bounds = array<i64: 4, 1>}, {pipeline_mode = #tpu.pipeline_mode<synchronous>, transform_indices = @transform_4, window_bounds = array<i64: 9, 4, 4>}, {pipeline_mode = #tpu.pipeline_mode<synchronous>, transform_indices = @transform_5, window_bounds = array<i64: 4, 1>}, {transform_indices = @transform_6, window_bounds = array<i64: 4, 256>}]} {
    %c0 = arith.constant 0 : index
    %c0_0 = arith.constant 0 : index
    %0 = vector.load %arg1[%c0, %c0_0] : memref<4x256xf32, #tpu.memory_space<vmem>>, vector<4x256xf32>
    %c0_1 = arith.constant 0 : index
    %c0_2 = arith.constant 0 : index
    %1 = vector.load %arg2[%c0_1, %c0_2] : memref<9x256xf32, #tpu.memory_space<vmem>>, vector<9x256xf32>
    %c17_i32 = arith.constant 17 : i32
    %2 = tpu.dynamic_rotate %0 by %c17_i32 dim 1 : vector<4x256xf32>, i32 -> vector<4x256xf32>
    %3 = vector.extract_strided_slice %1 {offsets = [0, 0], sizes = [1, 256], strides = [1, 1]} : vector<9x256xf32> to vector<1x256xf32>
    %4 = vector.broadcast %3 : vector<1x256xf32> to vector<4x256xf32>
    %5 = arith.mulf %2, %4 : vector<4x256xf32>
    %c0_3 = arith.constant 0 : index
    %c0_4 = arith.constant 0 : index
    %c0_5 = arith.constant 0 : index
    %6 = vector.load %arg3[%c0_3, %c0_4, %c0_5] : memref<9x4x4xbf16, #tpu.memory_space<vmem>>, vector<1x4x4xbf16>
    %7 = vector.shape_cast %6 : vector<1x4x4xbf16> to vector<4x4xbf16>
    %8 = arith.truncf %5 : vector<4x256xf32> to vector<4x256xbf16>
    %cst = arith.constant dense<0.000000e+00> : vector<4x256xf32>
    %9 = tpu.matmul %7, %8, %cst {dimension_numbers = #tpu.dot_dimension_numbers<[1], [0], [0], [1], [0, 0, 1, 1], [], []>} : vector<4x4xbf16>, vector<4x256xbf16>, vector<4x256xf32> -> vector<4x256xf32>
    %c16_i32 = arith.constant 16 : i32
    %10 = tpu.dynamic_rotate %0 by %c16_i32 dim 1 : vector<4x256xf32>, i32 -> vector<4x256xf32>
    %11 = vector.extract_strided_slice %1 {offsets = [1, 0], sizes = [1, 256], strides = [1, 1]} : vector<9x256xf32> to vector<1x256xf32>
    %12 = vector.broadcast %11 : vector<1x256xf32> to vector<4x256xf32>
    %13 = arith.mulf %10, %12 : vector<4x256xf32>
    %c1 = arith.constant 1 : index
    %c0_6 = arith.constant 0 : index
    %c0_7 = arith.constant 0 : index
    %14 = vector.load %arg3[%c1, %c0_6, %c0_7] : memref<9x4x4xbf16, #tpu.memory_space<vmem>>, vector<1x4x4xbf16>
    %15 = vector.shape_cast %14 : vector<1x4x4xbf16> to vector<4x4xbf16>
    %16 = arith.truncf %13 : vector<4x256xf32> to vector<4x256xbf16>
    %cst_8 = arith.constant dense<0.000000e+00> : vector<4x256xf32>
    %17 = tpu.matmul %15, %16, %cst_8 {dimension_numbers = #tpu.dot_dimension_numbers<[1], [0], [0], [1], [0, 0, 1, 1], [], []>} : vector<4x4xbf16>, vector<4x256xbf16>, vector<4x256xf32> -> vector<4x256xf32>
    %18 = arith.addf %9, %17 : vector<4x256xf32>
    %c15_i32 = arith.constant 15 : i32
    %19 = tpu.dynamic_rotate %0 by %c15_i32 dim 1 : vector<4x256xf32>, i32 -> vector<4x256xf32>
    %20 = vector.extract_strided_slice %1 {offsets = [2, 0], sizes = [1, 256], strides = [1, 1]} : vector<9x256xf32> to vector<1x256xf32>
    %21 = vector.broadcast %20 : vector<1x256xf32> to vector<4x256xf32>
    %22 = arith.mulf %19, %21 : vector<4x256xf32>
    %c2 = arith.constant 2 : index
    %c0_9 = arith.constant 0 : index
    %c0_10 = arith.constant 0 : index
    %23 = vector.load %arg3[%c2, %c0_9, %c0_10] : memref<9x4x4xbf16, #tpu.memory_space<vmem>>, vector<1x4x4xbf16>
    %24 = vector.shape_cast %23 : vector<1x4x4xbf16> to vector<4x4xbf16>
    %25 = arith.truncf %22 : vector<4x256xf32> to vector<4x256xbf16>
    %cst_11 = arith.constant dense<0.000000e+00> : vector<4x256xf32>
    %26 = tpu.matmul %24, %25, %cst_11 {dimension_numbers = #tpu.dot_dimension_numbers<[1], [0], [0], [1], [0, 0, 1, 1], [], []>} : vector<4x4xbf16>, vector<4x256xbf16>, vector<4x256xf32> -> vector<4x256xf32>
    %27 = arith.addf %18, %26 : vector<4x256xf32>
    %c1_i32 = arith.constant 1 : i32
    %28 = tpu.dynamic_rotate %0 by %c1_i32 dim 1 : vector<4x256xf32>, i32 -> vector<4x256xf32>
    %29 = vector.extract_strided_slice %1 {offsets = [3, 0], sizes = [1, 256], strides = [1, 1]} : vector<9x256xf32> to vector<1x256xf32>
    %30 = vector.broadcast %29 : vector<1x256xf32> to vector<4x256xf32>
    %31 = arith.mulf %28, %30 : vector<4x256xf32>
    %c3 = arith.constant 3 : index
    %c0_12 = arith.constant 0 : index
    %c0_13 = arith.constant 0 : index
    %32 = vector.load %arg3[%c3, %c0_12, %c0_13] : memref<9x4x4xbf16, #tpu.memory_space<vmem>>, vector<1x4x4xbf16>
    %33 = vector.shape_cast %32 : vector<1x4x4xbf16> to vector<4x4xbf16>
    %34 = arith.truncf %31 : vector<4x256xf32> to vector<4x256xbf16>
    %cst_14 = arith.constant dense<0.000000e+00> : vector<4x256xf32>
    %35 = tpu.matmul %33, %34, %cst_14 {dimension_numbers = #tpu.dot_dimension_numbers<[1], [0], [0], [1], [0, 0, 1, 1], [], []>} : vector<4x4xbf16>, vector<4x256xbf16>, vector<4x256xf32> -> vector<4x256xf32>
    %36 = arith.addf %27, %35 : vector<4x256xf32>
    %c4 = arith.constant 4 : index
    %c0_15 = arith.constant 0 : index
    %c0_16 = arith.constant 0 : index
    %37 = vector.load %arg3[%c4, %c0_15, %c0_16] : memref<9x4x4xbf16, #tpu.memory_space<vmem>>, vector<1x4x4xbf16>
    %38 = vector.shape_cast %37 : vector<1x4x4xbf16> to vector<4x4xbf16>
    %39 = arith.truncf %0 : vector<4x256xf32> to vector<4x256xbf16>
    %cst_17 = arith.constant dense<0.000000e+00> : vector<4x256xf32>
    %40 = tpu.matmul %38, %39, %cst_17 {dimension_numbers = #tpu.dot_dimension_numbers<[1], [0], [0], [1], [0, 0, 1, 1], [], []>} : vector<4x4xbf16>, vector<4x256xbf16>, vector<4x256xf32> -> vector<4x256xf32>
    %41 = arith.addf %36, %40 : vector<4x256xf32>
    %c255_i32 = arith.constant 255 : i32
    %42 = tpu.dynamic_rotate %0 by %c255_i32 dim 1 : vector<4x256xf32>, i32 -> vector<4x256xf32>
    %43 = vector.extract_strided_slice %1 {offsets = [5, 0], sizes = [1, 256], strides = [1, 1]} : vector<9x256xf32> to vector<1x256xf32>
    %44 = vector.broadcast %43 : vector<1x256xf32> to vector<4x256xf32>
    %45 = arith.mulf %42, %44 : vector<4x256xf32>
    %c5 = arith.constant 5 : index
    %c0_18 = arith.constant 0 : index
    %c0_19 = arith.constant 0 : index
    %46 = vector.load %arg3[%c5, %c0_18, %c0_19] : memref<9x4x4xbf16, #tpu.memory_space<vmem>>, vector<1x4x4xbf16>
    %47 = vector.shape_cast %46 : vector<1x4x4xbf16> to vector<4x4xbf16>
    %48 = arith.truncf %45 : vector<4x256xf32> to vector<4x256xbf16>
    %cst_20 = arith.constant dense<0.000000e+00> : vector<4x256xf32>
    %49 = tpu.matmul %47, %48, %cst_20 {dimension_numbers = #tpu.dot_dimension_numbers<[1], [0], [0], [1], [0, 0, 1, 1], [], []>} : vector<4x4xbf16>, vector<4x256xbf16>, vector<4x256xf32> -> vector<4x256xf32>
    %50 = arith.addf %41, %49 : vector<4x256xf32>
    %c241_i32 = arith.constant 241 : i32
    %51 = tpu.dynamic_rotate %0 by %c241_i32 dim 1 : vector<4x256xf32>, i32 -> vector<4x256xf32>
    %52 = vector.extract_strided_slice %1 {offsets = [6, 0], sizes = [1, 256], strides = [1, 1]} : vector<9x256xf32> to vector<1x256xf32>
    %53 = vector.broadcast %52 : vector<1x256xf32> to vector<4x256xf32>
    %54 = arith.mulf %51, %53 : vector<4x256xf32>
    %c6 = arith.constant 6 : index
    %c0_21 = arith.constant 0 : index
    %c0_22 = arith.constant 0 : index
    %55 = vector.load %arg3[%c6, %c0_21, %c0_22] : memref<9x4x4xbf16, #tpu.memory_space<vmem>>, vector<1x4x4xbf16>
    %56 = vector.shape_cast %55 : vector<1x4x4xbf16> to vector<4x4xbf16>
    %57 = arith.truncf %54 : vector<4x256xf32> to vector<4x256xbf16>
    %cst_23 = arith.constant dense<0.000000e+00> : vector<4x256xf32>
    %58 = tpu.matmul %56, %57, %cst_23 {dimension_numbers = #tpu.dot_dimension_numbers<[1], [0], [0], [1], [0, 0, 1, 1], [], []>} : vector<4x4xbf16>, vector<4x256xbf16>, vector<4x256xf32> -> vector<4x256xf32>
    %59 = arith.addf %50, %58 : vector<4x256xf32>
    %c240_i32 = arith.constant 240 : i32
    %60 = tpu.dynamic_rotate %0 by %c240_i32 dim 1 : vector<4x256xf32>, i32 -> vector<4x256xf32>
    %61 = vector.extract_strided_slice %1 {offsets = [7, 0], sizes = [1, 256], strides = [1, 1]} : vector<9x256xf32> to vector<1x256xf32>
    %62 = vector.broadcast %61 : vector<1x256xf32> to vector<4x256xf32>
    %63 = arith.mulf %60, %62 : vector<4x256xf32>
    %c7 = arith.constant 7 : index
    %c0_24 = arith.constant 0 : index
    %c0_25 = arith.constant 0 : index
    %64 = vector.load %arg3[%c7, %c0_24, %c0_25] : memref<9x4x4xbf16, #tpu.memory_space<vmem>>, vector<1x4x4xbf16>
    %65 = vector.shape_cast %64 : vector<1x4x4xbf16> to vector<4x4xbf16>
    %66 = arith.truncf %63 : vector<4x256xf32> to vector<4x256xbf16>
    %cst_26 = arith.constant dense<0.000000e+00> : vector<4x256xf32>
    %67 = tpu.matmul %65, %66, %cst_26 {dimension_numbers = #tpu.dot_dimension_numbers<[1], [0], [0], [1], [0, 0, 1, 1], [], []>} : vector<4x4xbf16>, vector<4x256xbf16>, vector<4x256xf32> -> vector<4x256xf32>
    %68 = arith.addf %59, %67 : vector<4x256xf32>
    %c239_i32 = arith.constant 239 : i32
    %69 = tpu.dynamic_rotate %0 by %c239_i32 dim 1 : vector<4x256xf32>, i32 -> vector<4x256xf32>
    %70 = vector.extract_strided_slice %1 {offsets = [8, 0], sizes = [1, 256], strides = [1, 1]} : vector<9x256xf32> to vector<1x256xf32>
    %71 = vector.broadcast %70 : vector<1x256xf32> to vector<4x256xf32>
    %72 = arith.mulf %69, %71 : vector<4x256xf32>
    %c8 = arith.constant 8 : index
    %c0_27 = arith.constant 0 : index
    %c0_28 = arith.constant 0 : index
    %73 = vector.load %arg3[%c8, %c0_27, %c0_28] : memref<9x4x4xbf16, #tpu.memory_space<vmem>>, vector<1x4x4xbf16>
    %74 = vector.shape_cast %73 : vector<1x4x4xbf16> to vector<4x4xbf16>
    %75 = arith.truncf %72 : vector<4x256xf32> to vector<4x256xbf16>
    %cst_29 = arith.constant dense<0.000000e+00> : vector<4x256xf32>
    %76 = tpu.matmul %74, %75, %cst_29 {dimension_numbers = #tpu.dot_dimension_numbers<[1], [0], [0], [1], [0, 0, 1, 1], [], []>} : vector<4x4xbf16>, vector<4x256xbf16>, vector<4x256xf32> -> vector<4x256xf32>
    %77 = arith.addf %68, %76 : vector<4x256xf32>
    %c0_30 = arith.constant 0 : index
    %c0_31 = arith.constant 0 : index
    %78 = vector.load %arg4[%c0_30, %c0_31] : memref<4x1xf32, #tpu.memory_space<vmem>>, vector<4x1xf32>
    %79 = vector.broadcast %78 : vector<4x1xf32> to vector<4x256xf32>
    %80 = arith.addf %77, %79 : vector<4x256xf32>
    %cst_32 = arith.constant 0.000000e+00 : f32
    %81 = vector.broadcast %cst_32 : f32 to vector<4x256xf32>
    %82 = arith.maximumf %80, %81 : vector<4x256xf32>
    %c17_i32_33 = arith.constant 17 : i32
    %83 = tpu.dynamic_rotate %82 by %c17_i32_33 dim 1 : vector<4x256xf32>, i32 -> vector<4x256xf32>
    %84 = vector.extract_strided_slice %1 {offsets = [0, 0], sizes = [1, 256], strides = [1, 1]} : vector<9x256xf32> to vector<1x256xf32>
    %85 = vector.broadcast %84 : vector<1x256xf32> to vector<4x256xf32>
    %86 = arith.mulf %83, %85 : vector<4x256xf32>
    %c0_34 = arith.constant 0 : index
    %c0_35 = arith.constant 0 : index
    %c0_36 = arith.constant 0 : index
    %87 = vector.load %arg5[%c0_34, %c0_35, %c0_36] : memref<9x4x4xbf16, #tpu.memory_space<vmem>>, vector<1x4x4xbf16>
    %88 = vector.shape_cast %87 : vector<1x4x4xbf16> to vector<4x4xbf16>
    %89 = arith.truncf %86 : vector<4x256xf32> to vector<4x256xbf16>
    %cst_37 = arith.constant dense<0.000000e+00> : vector<4x256xf32>
    %90 = tpu.matmul %88, %89, %cst_37 {dimension_numbers = #tpu.dot_dimension_numbers<[1], [0], [0], [1], [0, 0, 1, 1], [], []>} : vector<4x4xbf16>, vector<4x256xbf16>, vector<4x256xf32> -> vector<4x256xf32>
    %c16_i32_38 = arith.constant 16 : i32
    %91 = tpu.dynamic_rotate %82 by %c16_i32_38 dim 1 : vector<4x256xf32>, i32 -> vector<4x256xf32>
    %92 = vector.extract_strided_slice %1 {offsets = [1, 0], sizes = [1, 256], strides = [1, 1]} : vector<9x256xf32> to vector<1x256xf32>
    %93 = vector.broadcast %92 : vector<1x256xf32> to vector<4x256xf32>
    %94 = arith.mulf %91, %93 : vector<4x256xf32>
    %c1_39 = arith.constant 1 : index
    %c0_40 = arith.constant 0 : index
    %c0_41 = arith.constant 0 : index
    %95 = vector.load %arg5[%c1_39, %c0_40, %c0_41] : memref<9x4x4xbf16, #tpu.memory_space<vmem>>, vector<1x4x4xbf16>
    %96 = vector.shape_cast %95 : vector<1x4x4xbf16> to vector<4x4xbf16>
    %97 = arith.truncf %94 : vector<4x256xf32> to vector<4x256xbf16>
    %cst_42 = arith.constant dense<0.000000e+00> : vector<4x256xf32>
    %98 = tpu.matmul %96, %97, %cst_42 {dimension_numbers = #tpu.dot_dimension_numbers<[1], [0], [0], [1], [0, 0, 1, 1], [], []>} : vector<4x4xbf16>, vector<4x256xbf16>, vector<4x256xf32> -> vector<4x256xf32>
    %99 = arith.addf %90, %98 : vector<4x256xf32>
    %c15_i32_43 = arith.constant 15 : i32
    %100 = tpu.dynamic_rotate %82 by %c15_i32_43 dim 1 : vector<4x256xf32>, i32 -> vector<4x256xf32>
    %101 = vector.extract_strided_slice %1 {offsets = [2, 0], sizes = [1, 256], strides = [1, 1]} : vector<9x256xf32> to vector<1x256xf32>
    %102 = vector.broadcast %101 : vector<1x256xf32> to vector<4x256xf32>
    %103 = arith.mulf %100, %102 : vector<4x256xf32>
    %c2_44 = arith.constant 2 : index
    %c0_45 = arith.constant 0 : index
    %c0_46 = arith.constant 0 : index
    %104 = vector.load %arg5[%c2_44, %c0_45, %c0_46] : memref<9x4x4xbf16, #tpu.memory_space<vmem>>, vector<1x4x4xbf16>
    %105 = vector.shape_cast %104 : vector<1x4x4xbf16> to vector<4x4xbf16>
    %106 = arith.truncf %103 : vector<4x256xf32> to vector<4x256xbf16>
    %cst_47 = arith.constant dense<0.000000e+00> : vector<4x256xf32>
    %107 = tpu.matmul %105, %106, %cst_47 {dimension_numbers = #tpu.dot_dimension_numbers<[1], [0], [0], [1], [0, 0, 1, 1], [], []>} : vector<4x4xbf16>, vector<4x256xbf16>, vector<4x256xf32> -> vector<4x256xf32>
    %108 = arith.addf %99, %107 : vector<4x256xf32>
    %c1_i32_48 = arith.constant 1 : i32
    %109 = tpu.dynamic_rotate %82 by %c1_i32_48 dim 1 : vector<4x256xf32>, i32 -> vector<4x256xf32>
    %110 = vector.extract_strided_slice %1 {offsets = [3, 0], sizes = [1, 256], strides = [1, 1]} : vector<9x256xf32> to vector<1x256xf32>
    %111 = vector.broadcast %110 : vector<1x256xf32> to vector<4x256xf32>
    %112 = arith.mulf %109, %111 : vector<4x256xf32>
    %c3_49 = arith.constant 3 : index
    %c0_50 = arith.constant 0 : index
    %c0_51 = arith.constant 0 : index
    %113 = vector.load %arg5[%c3_49, %c0_50, %c0_51] : memref<9x4x4xbf16, #tpu.memory_space<vmem>>, vector<1x4x4xbf16>
    %114 = vector.shape_cast %113 : vector<1x4x4xbf16> to vector<4x4xbf16>
    %115 = arith.truncf %112 : vector<4x256xf32> to vector<4x256xbf16>
    %cst_52 = arith.constant dense<0.000000e+00> : vector<4x256xf32>
    %116 = tpu.matmul %114, %115, %cst_52 {dimension_numbers = #tpu.dot_dimension_numbers<[1], [0], [0], [1], [0, 0, 1, 1], [], []>} : vector<4x4xbf16>, vector<4x256xbf16>, vector<4x256xf32> -> vector<4x256xf32>
    %117 = arith.addf %108, %116 : vector<4x256xf32>
    %c4_53 = arith.constant 4 : index
    %c0_54 = arith.constant 0 : index
    %c0_55 = arith.constant 0 : index
    %118 = vector.load %arg5[%c4_53, %c0_54, %c0_55] : memref<9x4x4xbf16, #tpu.memory_space<vmem>>, vector<1x4x4xbf16>
    %119 = vector.shape_cast %118 : vector<1x4x4xbf16> to vector<4x4xbf16>
    %120 = arith.truncf %82 : vector<4x256xf32> to vector<4x256xbf16>
    %cst_56 = arith.constant dense<0.000000e+00> : vector<4x256xf32>
    %121 = tpu.matmul %119, %120, %cst_56 {dimension_numbers = #tpu.dot_dimension_numbers<[1], [0], [0], [1], [0, 0, 1, 1], [], []>} : vector<4x4xbf16>, vector<4x256xbf16>, vector<4x256xf32> -> vector<4x256xf32>
    %122 = arith.addf %117, %121 : vector<4x256xf32>
    %c255_i32_57 = arith.constant 255 : i32
    %123 = tpu.dynamic_rotate %82 by %c255_i32_57 dim 1 : vector<4x256xf32>, i32 -> vector<4x256xf32>
    %124 = vector.extract_strided_slice %1 {offsets = [5, 0], sizes = [1, 256], strides = [1, 1]} : vector<9x256xf32> to vector<1x256xf32>
    %125 = vector.broadcast %124 : vector<1x256xf32> to vector<4x256xf32>
    %126 = arith.mulf %123, %125 : vector<4x256xf32>
    %c5_58 = arith.constant 5 : index
    %c0_59 = arith.constant 0 : index
    %c0_60 = arith.constant 0 : index
    %127 = vector.load %arg5[%c5_58, %c0_59, %c0_60] : memref<9x4x4xbf16, #tpu.memory_space<vmem>>, vector<1x4x4xbf16>
    %128 = vector.shape_cast %127 : vector<1x4x4xbf16> to vector<4x4xbf16>
    %129 = arith.truncf %126 : vector<4x256xf32> to vector<4x256xbf16>
    %cst_61 = arith.constant dense<0.000000e+00> : vector<4x256xf32>
    %130 = tpu.matmul %128, %129, %cst_61 {dimension_numbers = #tpu.dot_dimension_numbers<[1], [0], [0], [1], [0, 0, 1, 1], [], []>} : vector<4x4xbf16>, vector<4x256xbf16>, vector<4x256xf32> -> vector<4x256xf32>
    %131 = arith.addf %122, %130 : vector<4x256xf32>
    %c241_i32_62 = arith.constant 241 : i32
    %132 = tpu.dynamic_rotate %82 by %c241_i32_62 dim 1 : vector<4x256xf32>, i32 -> vector<4x256xf32>
    %133 = vector.extract_strided_slice %1 {offsets = [6, 0], sizes = [1, 256], strides = [1, 1]} : vector<9x256xf32> to vector<1x256xf32>
    %134 = vector.broadcast %133 : vector<1x256xf32> to vector<4x256xf32>
    %135 = arith.mulf %132, %134 : vector<4x256xf32>
    %c6_63 = arith.constant 6 : index
    %c0_64 = arith.constant 0 : index
    %c0_65 = arith.constant 0 : index
    %136 = vector.load %arg5[%c6_63, %c0_64, %c0_65] : memref<9x4x4xbf16, #tpu.memory_space<vmem>>, vector<1x4x4xbf16>
    %137 = vector.shape_cast %136 : vector<1x4x4xbf16> to vector<4x4xbf16>
    %138 = arith.truncf %135 : vector<4x256xf32> to vector<4x256xbf16>
    %cst_66 = arith.constant dense<0.000000e+00> : vector<4x256xf32>
    %139 = tpu.matmul %137, %138, %cst_66 {dimension_numbers = #tpu.dot_dimension_numbers<[1], [0], [0], [1], [0, 0, 1, 1], [], []>} : vector<4x4xbf16>, vector<4x256xbf16>, vector<4x256xf32> -> vector<4x256xf32>
    %140 = arith.addf %131, %139 : vector<4x256xf32>
    %c240_i32_67 = arith.constant 240 : i32
    %141 = tpu.dynamic_rotate %82 by %c240_i32_67 dim 1 : vector<4x256xf32>, i32 -> vector<4x256xf32>
    %142 = vector.extract_strided_slice %1 {offsets = [7, 0], sizes = [1, 256], strides = [1, 1]} : vector<9x256xf32> to vector<1x256xf32>
    %143 = vector.broadcast %142 : vector<1x256xf32> to vector<4x256xf32>
    %144 = arith.mulf %141, %143 : vector<4x256xf32>
    %c7_68 = arith.constant 7 : index
    %c0_69 = arith.constant 0 : index
    %c0_70 = arith.constant 0 : index
    %145 = vector.load %arg5[%c7_68, %c0_69, %c0_70] : memref<9x4x4xbf16, #tpu.memory_space<vmem>>, vector<1x4x4xbf16>
    %146 = vector.shape_cast %145 : vector<1x4x4xbf16> to vector<4x4xbf16>
    %147 = arith.truncf %144 : vector<4x256xf32> to vector<4x256xbf16>
    %cst_71 = arith.constant dense<0.000000e+00> : vector<4x256xf32>
    %148 = tpu.matmul %146, %147, %cst_71 {dimension_numbers = #tpu.dot_dimension_numbers<[1], [0], [0], [1], [0, 0, 1, 1], [], []>} : vector<4x4xbf16>, vector<4x256xbf16>, vector<4x256xf32> -> vector<4x256xf32>
    %149 = arith.addf %140, %148 : vector<4x256xf32>
    %c239_i32_72 = arith.constant 239 : i32
    %150 = tpu.dynamic_rotate %82 by %c239_i32_72 dim 1 : vector<4x256xf32>, i32 -> vector<4x256xf32>
    %151 = vector.extract_strided_slice %1 {offsets = [8, 0], sizes = [1, 256], strides = [1, 1]} : vector<9x256xf32> to vector<1x256xf32>
    %152 = vector.broadcast %151 : vector<1x256xf32> to vector<4x256xf32>
    %153 = arith.mulf %150, %152 : vector<4x256xf32>
    %c8_73 = arith.constant 8 : index
    %c0_74 = arith.constant 0 : index
    %c0_75 = arith.constant 0 : index
    %154 = vector.load %arg5[%c8_73, %c0_74, %c0_75] : memref<9x4x4xbf16, #tpu.memory_space<vmem>>, vector<1x4x4xbf16>
    %155 = vector.shape_cast %154 : vector<1x4x4xbf16> to vector<4x4xbf16>
    %156 = arith.truncf %153 : vector<4x256xf32> to vector<4x256xbf16>
    %cst_76 = arith.constant dense<0.000000e+00> : vector<4x256xf32>
    %157 = tpu.matmul %155, %156, %cst_76 {dimension_numbers = #tpu.dot_dimension_numbers<[1], [0], [0], [1], [0, 0, 1, 1], [], []>} : vector<4x4xbf16>, vector<4x256xbf16>, vector<4x256xf32> -> vector<4x256xf32>
    %158 = arith.addf %149, %157 : vector<4x256xf32>
    %c0_77 = arith.constant 0 : index
    %c0_78 = arith.constant 0 : index
    %159 = vector.load %arg6[%c0_77, %c0_78] : memref<4x1xf32, #tpu.memory_space<vmem>>, vector<4x1xf32>
    %160 = vector.broadcast %159 : vector<4x1xf32> to vector<4x256xf32>
    %161 = arith.addf %158, %160 : vector<4x256xf32>
    %cst_79 = arith.constant 0.000000e+00 : f32
    %162 = vector.broadcast %cst_79 : f32 to vector<4x256xf32>
    %163 = arith.maximumf %161, %162 : vector<4x256xf32>
    %164 = arith.addf %0, %163 : vector<4x256xf32>
    %c0_80 = arith.constant 0 : index
    %c0_81 = arith.constant 0 : index
    %165 = vector.load %arg7[%c0_80, %c0_81] : memref<4x256xf32, #tpu.memory_space<vmem>>, vector<4x256xf32>
    tpu.vector_store %arg7[%c0_80, %c0_81], %164 {strides = array<i32>} : memref<4x256xf32, #tpu.memory_space<vmem>>, vector<4x256xf32>,
    return
  }
  func.func @transform_0(%arg0: i32) -> (i32, i32) {
    %c0_i32 = arith.constant 0 : i32
    %c0_i32_0 = arith.constant 0 : i32
    return %c0_i32, %arg0 : i32, i32
  }
  func.func @transform_1(%arg0: i32) -> (i32, i32) {
    %c0_i32 = arith.constant 0 : i32
    %c0_i32_0 = arith.constant 0 : i32
    %c0_i32_1 = arith.constant 0 : i32
    return %c0_i32, %c0_i32_0 : i32, i32
  }
  func.func @transform_2(%arg0: i32) -> (i32, i32, i32) {
    %c0_i32 = arith.constant 0 : i32
    %c0_i32_0 = arith.constant 0 : i32
    %c0_i32_1 = arith.constant 0 : i32
    %c0_i32_2 = arith.constant 0 : i32
    return %c0_i32, %c0_i32_0, %c0_i32_1 : i32, i32, i32
  }
  func.func @transform_3(%arg0: i32) -> (i32, i32) {
    %c0_i32 = arith.constant 0 : i32
    %c0_i32_0 = arith.constant 0 : i32
    %c0_i32_1 = arith.constant 0 : i32
    return %c0_i32, %c0_i32_0 : i32, i32
  }
  func.func @transform_4(%arg0: i32) -> (i32, i32, i32) {
    %c0_i32 = arith.constant 0 : i32
    %c0_i32_0 = arith.constant 0 : i32
    %c0_i32_1 = arith.constant 0 : i32
    %c0_i32_2 = arith.constant 0 : i32
    return %c0_i32, %c0_i32_0, %c0_i32_1 : i32, i32, i32
  }
  func.func @transform_5(%arg0: i32) -> (i32, i32) {
    %c0_i32 = arith.constant 0 : i32
    %c0_i32_0 = arith.constant 0 : i32
    %c0_i32_1 = arith.constant 0 : i32
    return %c0_i32, %c0_i32_0 : i32, i32
  }
  func.func @transform_6(%arg0: i32) -> (i32, i32) {
    %c0_i32 = arith.constant 0 : i32
    %c0_i32_0 = arith.constant 0 : i32
    return %c0_i32, %arg0 : i32, i32
  }
}

</mosaic_0001>

<bundles_post_ra>
// kernel: residual_block.1
= control target key start
LH: loop header
LB: loop body
LE: loop exit
PB: predicated region body
PF: predicated region fallthrough
CT: control target
= control target key end

     0   :  { %s1684_s21 = smov 0   ;;  %s2101_s0 = inlined_call_operand.vmem [shape: f32[4,512], index: 0, kind: input, shape index: {}]   ;;  %s2102_s1 = inlined_call_operand.vmem [shape: f32[9,256], index: 1, kind: input, shape index: {}]   ;;  %s2103_s2 = inlined_call_operand.vmem [shape: bf16[9,4,4], index: 2, kind: input, shape index: {}]   ;;  %s2104_s3 = inlined_call_operand.vmem [shape: f32[4,1], index: 3, kind: input, shape index: {}]   ;;  %s2105_s4 = inlined_call_operand.vmem [shape: bf16[9,4,4], index: 4, kind: input, shape index: {}]   ;;  %s2106_s5 = inlined_call_operand.vmem [shape: f32[4,1], index: 5, kind: input, shape index: {}]   ;;  %s2107_s6 = inlined_call_operand.vmem [shape: f32[4,512], index: 6, kind: output, shape index: {}]  }
   0x1 LB: > { %s1548_s22 = sadd.s32 4294967295, %s1638_s21   ;;  %p1552_p0 = scmp.ge.s32.totalorder %s1638_s21, 1  ;;  %s1638_s21 = sphi %s1684_s21, %s16_s21  }
   0x2   : > { %p213_p1 = scmp.lt.s32.totalorder %s1638_s21, 3 }
   0x4   : > { %p214_p2 = pnand %p1552_p0, %p213_p1 }
   0x5   : > { %s1553_s23 = sshll.u32 (!%p214_p2), %s1548_s22, 1  ;;  %s1640_s28 = smov (!%p214_p2), 17  }
   0x6   : > { %217 = sbr.rel (%p214_p2) target bundleno = 740 (0x2e4), region = 44  ;;  %p244_p3 = scmp.lt.s32.totalorder (!%p214_p2), %s1553_s23, 3 }
   0x7   : > { %s1641_s29 = smov (!%p214_p2), 16   ;;  %s1643_s30 = smov (!%p214_p2), 15  }
   0x8   : > { %s1644_s7 = smov (!%p214_p2), 1   ;;  %s1645_s8 = smov (!%p214_p2), 127  }
   0x9   : > { %s1646_s9 = smov (!%p214_p2), 113   ;;  %s1647_s10 = smov (!%p214_p2), 112  }
   0xa   : > { %s1648_s11 = smov (!%p214_p2), 111  }
   0xb   : > { %s2109_s23 = smov (!%p244_p3, %s1553_s23), 3  ;;  %v1642_v2 = vmov 0   ;;  %v903_v3 = vld [vmem:[%s2104_s3] sm:$0xf]  ;;  %v268_v4 = vlaneseq  ;;  %v1758_v10 = vld [vmem:[%s2102_s1 + $0x8] sm:$0xff]  ;;  %vm311_vm3 = vcmask 1041408  }
   0xc   : > { %s1554_s24 = sshll.u32 %s2109_s23, 2  ;;  %350 = vmatprep.mubr.bf16.mxu0 %v1642_v2  ;;  %400 = vmatprep.mubr.bf16.mxu1 %v1642_v2  ;;  %v1753_v9 = vld [vmem:[%s2102_s1] sm:$0xff]  ;;  %vm307_vm5 = vcmask 31744  }
   0xd   : > { %s247_s27 = scalar_lea.vmem %s2101_s0, %s1554_s24  ;;  %1630 = vset.pattern.permute.xlu0 %v1642_v2  ;;  %v1744_v5 = vshrl.u32 %v268_v4, 7  ;;  %v1746_v6 = vand.u32 127, %v268_v4  ;;  %v1557_v46 = vld [vmem:[%s2103_s2 + $0x2] sm:$0x3]  ;;  %v283_v47 = vld [vmem:[%s2103_s2] sm:$0x3] }
   0xe   : > { %v1700_v0 = vld [vmem:[%s247_s27] sm:$0xff] }
   0xf   : > { %264 = vrot.lane.b32.xlu1 %v1700_v0, %s1640_s28  ;;  %286 = vrot.lane.b32.xlu0 %v1700_v0, %s1641_s29  ;;  %v1708_v1 = vcombine.high %v1700_v0, %v1700_v0  ;;  %v275_v7 = vsub.s32 0, %v1744_v5  ;;  %v295_v8 = vsub.s32 1, %v1744_v5  ;;  %v418_v13 = vsub.s32 2, %v1744_v5 }
  0x10   : > { %vm270_vm0 = vcmp.lt.s32.totalorder %v1746_v6, 17  ;;  %vm290_vm1 = vcmp.lt.s32.totalorder %v1746_v6, 16  ;;  %vm413_vm2 = vcmp.lt.s32.totalorder %v1746_v6, 15  ;;  %v491_v22 = vsub.s32 3, %v1744_v5 }
  0x11   : > { %v1764_v14 = vrot.slane %v1753_v9, %v275_v7  ;;  %v1767_v15 = vrot.slane %v1753_v9, %v295_v8  ;;  %v1770_v16 = vrot.slane %v1758_v10, %v295_v8  ;;  %v1773_v17 = vrot.slane %v1758_v10, %v275_v7 }
  0x12   : > { %v1777_v20 = vrot.slane %v1753_v9, %v418_v13  ;;  %v1780_v21 = vrot.slane %v1758_v10, %v418_v13  ;;  %vm486_vm4 = vcmp.lt.s32.totalorder %v1746_v6, 1  ;;  %v620_v31 = vsub.s32 5, %v1744_v5 }
  0x13   : > { %266 = vrot.lane.b32.xlu1 %v1708_v1, %s1640_s28  ;;  %288 = vrot.lane.b32.xlu0 %v1708_v1, %s1641_s29  ;;  %v1802_v40 = vrot.slane %v1753_v9, %v491_v22  ;;  %v1805_v41 = vrot.slane %v1758_v10, %v491_v22  ;;  %vm615_vm6 = vcmp.lt.s32.totalorder %v1746_v6, 127  ;;  %v693_v55 = vsub.s32 6, %v1744_v5  ;;  %v1562_v22 = vld [vmem:[%s2103_s2 + $0x4] sm:$0x3] }
  0x14   : > { %v1821_v52 = vrot.slane %v1753_v9, %v620_v31  ;;  %v558_v56 = vpack.c.bf16 %v1708_v1, %v1708_v1  ;;  %v1836_v60 = vrot.slane %v1758_v10, %v620_v31  ;;  %vm688_vm7 = vcmp.lt.s32.totalorder %v1746_v6, 113 }
  0x15   : > { %v1849_v8 = vrot.slane %v1753_v9, %v693_v55  ;;  %vm761_vm8 = vcmp.lt.s32.totalorder %v1746_v6, 112  ;;  %vm834_vm9 = vcmp.lt.s32.totalorder %v1746_v6, 111 }
  0x17   : > { %411 = vrot.lane.b32.xlu1 %v1708_v1, %s1643_s30  ;;  %409 = vrot.lane.b32.xlu0 %v1700_v0, %s1643_s30 }
  0x1b   : > { %484 = vrot.lane.b32.xlu1 %v1708_v1, %s1644_s7  ;;  %482 = vrot.lane.b32.xlu0 %v1700_v0, %s1644_s7 }
  0x1f   : > { %613 = vrot.lane.b32.xlu1 %v1708_v1, %s1645_s8  ;;  %611 = vrot.lane.b32.xlu0 %v1700_v0, %s1645_s8 }
  0x23   : > { %686 = vrot.lane.b32.xlu1 %v1708_v1, %s1646_s9  ;;  %684 = vrot.lane.b32.xlu0 %v1700_v0, %s1646_s9 }
  0x27   : > { %759 = vrot.lane.b32.xlu1 %v1708_v1, %s1647_s10  ;;  %757 = vrot.lane.b32.xlu0 %v1700_v0, %s1647_s10 }
  0x2b   : > { %832 = vrot.lane.b32.xlu1 %v1708_v1, %s1648_s11  ;;  %830 = vrot.lane.b32.xlu0 %v1700_v0, %s1648_s11 }
  0x2f   : > { %906 = vperm.xlu0 %1630, %v903_v3   ;;  %v557_v3 = vpack.c.bf16 %v1700_v0, %v1700_v0 }
  0x81   : > { %v265_v11 = vpop.permute.xlu1 %264  ;;  %v287_v12 = vpop.permute.xlu0 %286 }
  0x85   : > { %v267_v18 = vpop.permute.xlu1 %266  ;;  %v289_v19 = vpop.permute.xlu0 %288 }
  0x86   : > { %v271_v23 = vsel %vm270_vm0, %v265_v11, %v267_v18  ;;  %v272_v24 = vsel %vm270_vm0, %v267_v18, %v265_v11  ;;  %v291_v25 = vsel %vm290_vm1, %v287_v12, %v289_v19  ;;  %v292_v26 = vsel %vm290_vm1, %v289_v19, %v287_v12 }
  0x87   : > { %v281_v27 = vmul.f32 %v1764_v14, %v272_v24  ;;  %v301_v28 = vmul.f32 %v1767_v15, %v292_v26  ;;  %v302_v29 = vmul.f32 %v1770_v16, %v291_v25  ;;  %v282_v30 = vmul.f32 %v1773_v17, %v271_v23 }
  0x88   : > { %v766_v11 = vsub.s32 7, %v1744_v5  ;;  %v1858_v19 = vrot.slane %v1758_v10, %v693_v55  ;;  %v1565_v5 = vld [vmem:[%s2103_s2 + $0x6] sm:$0x3] }
  0x89   : > { %v412_v32 = vpop.permute.xlu1 %411  ;;  %v410_v33 = vpop.permute.xlu0 %409  ;;  %v306_v34 = vpack.c.bf16 %v302_v29, %v302_v29  ;;  %v285_v35 = vpack.c.bf16 %v282_v30, %v282_v30  ;;  %v305_v36 = vpack.c.bf16 %v301_v28, %v301_v28  ;;  %v284_v37 = vpack.c.bf16 %v281_v27, %v281_v27 }
  0x8a   : > { %v414_v38 = vsel %vm413_vm2, %v410_v33, %v412_v32  ;;  %v415_v39 = vsel %vm413_vm2, %v412_v32, %v410_v33  ;;  %v563_v27 = vsel %vm311_vm3, %v557_v3, 0  ;;  %v1873_v30 = vrot.slane %v1753_v9, %v766_v11 }
  0x8b   : > { %v424_v42 = vmul.f32 %v1777_v20, %v415_v39  ;;  %v425_v43 = vmul.f32 %v1780_v21, %v414_v38  ;;  %1558 = vmatprep.subr.msk.bf16.mxu0 %vm311_vm3, %v306_v34  ;;  %1560 = vmatprep.subr.msk.bf16.mxu1 %vm311_vm3, %v285_v35  ;;  %v313_v44 = vsel %vm311_vm3, %v305_v36, 0  ;;  %v363_v45 = vsel %vm311_vm3, %v284_v37, 0 }
  0x8c   : > { %333 = vmatpush1.bf16.msra.mxu0 %v313_v44  ;;  %383 = vmatpush1.bf16.msra.mxu1 %v363_v45  ;;  %v1881_v34 = vrot.slane %v1758_v10, %v766_v11  ;;  %v1571_v44 = vld [vmem:[%s2103_s2 + $0xa] sm:$0x3]  ;;  %v1903_v45 = vld [vmem:[%s2102_s1 + $0x10] ss:$0 sm:$0xff] }
  0x8d   : > { %v428_v48 = vpack.c.bf16 %v424_v42, %v424_v42  ;;  %v429_v49 = vpack.c.bf16 %v425_v43, %v425_v43  ;;  %v485_v50 = vpop.permute.xlu1 %484  ;;  %v483_v51 = vpop.permute.xlu0 %482  ;;  %v1568_v43 = vld [vmem:[%s2103_s2 + $0x8] sm:$0x3] }
  0x8e   : > { %v487_v53 = vsel %vm486_vm4, %v483_v51, %v485_v50  ;;  %v488_v54 = vsel %vm486_vm4, %v485_v50, %v483_v51 }
  0x8f   : > { %v497_v57 = vmul.f32 %v1802_v40, %v488_v54  ;;  %v498_v58 = vmul.f32 %v1805_v41, %v487_v53  ;;  %1559 = vmatmul.mubr.msk.bf16.vlgmr.msra.gmra.mxu0 %vm307_vm5, %v1557_v46  ;;  %1561 = vmatmul.mubr.msk.bf16.vlgmr.msra.gmra.mxu1 %vm307_vm5, %v283_v47  ;;  %v434_v59 = vsel %vm311_vm3, %v428_v48, 0  ;;  %v1908_v46 = vld [vmem:[%s2102_s1 + $0x18] ss:$0 sm:$0xff] }
  0x90   : > { %1563 = vmatprep.subr.msk.bf16.mxu0 %vm311_vm3, %v429_v49  ;;  %471 = vmatprep.mubr.bf16.mxu0 %v1642_v2 }
  0x91   : > { %v501_v61 = vpack.c.bf16 %v497_v57, %v497_v57  ;;  %v502_v62 = vpack.c.bf16 %v498_v58, %v498_v58  ;;  %454 = vmatpush1.bf16.msra.mxu0 %v434_v59  ;;  %v614_v63 = vpop.permute.xlu1 %613  ;;  %v612_v1 = vpop.permute.xlu0 %611  ;;  %544 = vmatprep.mubr.bf16.mxu1 %v1642_v2 }
  0x92   : > { %v616_v4 = vsel %vm615_vm6, %v612_v1, %v614_v63  ;;  %v617_v7 = vsel %vm615_vm6, %v614_v63, %v612_v1  ;;  %1569 = vmatprep.subr.msk.bf16.mxu0 %vm311_vm3, %v558_v56  ;;  %v1582_v1 = vld [vmem:[%s2103_s2 + $0x10] sm:$0x3] }
  0x93   : > { %1566 = vmatprep.subr.msk.bf16.mxu1 %vm311_vm3, %v502_v62  ;;  %v507_v12 = vsel %vm311_vm3, %v501_v61, 0  ;;  %v626_v13 = vmul.f32 %v1821_v52, %v616_v4  ;;  %v627_v18 = vmul.f32 %v1836_v60, %v617_v7  ;;  %v1574_v61 = vld [vmem:[%s2103_s2 + $0xc] sm:$0x3]  ;;  %v1577_v62 = vld [vmem:[%s2103_s2 + $0xe] sm:$0x3] }
  0x94   : > { %527 = vmatpush1.bf16.msra.mxu1 %v507_v12 }
  0x95   : > { %v630_v23 = vpack.c.bf16 %v626_v13, %v626_v13  ;;  %v631_v24 = vpack.c.bf16 %v627_v18, %v627_v18  ;;  %v687_v25 = vpop.permute.xlu1 %686  ;;  %v685_v26 = vpop.permute.xlu0 %684 }
  0x96   : > { %v689_v28 = vsel %vm688_vm7, %v685_v26, %v687_v25  ;;  %v690_v29 = vsel %vm688_vm7, %v687_v25, %v685_v26 }
  0x97   : > { %1564 = vmatmul.mubr.msk.bf16.vlgmr.msra.gmra.mxu0 %vm307_vm5, %v1562_v22  ;;  %1567 = vmatmul.mubr.msk.bf16.vlgmr.msra.gmra.mxu1 %vm307_vm5, %v1565_v5  ;;  %v699_v31 = vmul.f32 %v1849_v8, %v689_v28  ;;  %v700_v32 = vmul.f32 %v1858_v19, %v690_v29  ;;  %v636_v33 = vsel %vm311_vm3, %v630_v23, 0 }
  0x98   : > { %1572 = vmatprep.subr.msk.bf16.mxu1 %vm311_vm3, %v631_v24  ;;  %583 = vmatpush1.bf16.msra.mxu0 %v563_v27 }
  0x99   : > { %v703_v35 = vpack.c.bf16 %v699_v31, %v699_v31  ;;  %v704_v36 = vpack.c.bf16 %v700_v32, %v700_v32  ;;  %656 = vmatpush1.bf16.msra.mxu1 %v636_v33  ;;  %v760_v9 = vpop.permute.xlu1 %759  ;;  %v758_v37 = vpop.permute.xlu0 %757  ;;  %600 = vmatprep.mubr.bf16.mxu0 %v1642_v2 }
  0x9a   : > { %v762_v38 = vsel %vm761_vm8, %v758_v37, %v760_v9  ;;  %v763_v39 = vsel %vm761_vm8, %v760_v9, %v758_v37  ;;  %673 = vmatprep.mubr.bf16.mxu1 %v1642_v2 }
  0x9b   : > { %v772_v10 = vmul.f32 %v1873_v30, %v762_v38  ;;  %v773_v42 = vmul.f32 %v1881_v34, %v763_v39  ;;  %1575 = vmatprep.subr.msk.bf16.mxu0 %vm311_vm3, %v704_v36  ;;  %v709_v49 = vsel %vm311_vm3, %v703_v35, 0 }
  0x9d   : > { %v776_v47 = vpack.c.bf16 %v772_v10, %v772_v10  ;;  %v777_v48 = vpack.c.bf16 %v773_v42, %v773_v42  ;;  %v833_v50 = vpop.permute.xlu1 %832  ;;  %v831_v51 = vpop.permute.xlu0 %830 }
  0x9e   : > { %v835_v53 = vsel %vm834_vm9, %v831_v51, %v833_v50  ;;  %v836_v54 = vsel %vm834_vm9, %v833_v50, %v831_v51 }
  0x9f   : > { %1570 = vmatmul.mubr.msk.bf16.vlgmr.msra.gmra.mxu0 %vm307_vm5, %v1568_v43  ;;  %1573 = vmatmul.mubr.msk.bf16.vlgmr.msra.gmra.mxu1 %vm307_vm5, %v1571_v44  ;;  %v782_v55 = vsel %vm311_vm3, %v776_v47, 0  ;;  %v845_v56 = vmul.f32 %v1903_v45, %v835_v53  ;;  %v846_v57 = vmul.f32 %v1908_v46, %v836_v54 }
  0xa0   : > { %1578 = vmatprep.subr.msk.bf16.mxu1 %vm311_vm3, %v777_v48  ;;  %729 = vmatpush1.bf16.msra.mxu0 %v709_v49 }
  0xa1   : > { %802 = vmatpush1.bf16.msra.mxu1 %v782_v55  ;;  %v849_v58 = vpack.c.bf16 %v845_v56, %v845_v56  ;;  %v850_v59 = vpack.c.bf16 %v846_v57, %v846_v57  ;;  %746 = vmatprep.mubr.bf16.mxu0 %v1642_v2 }
  0xa2   : > { %819 = vmatprep.mubr.bf16.mxu1 %v1642_v2 }
  0xa3   : > { %1583 = vmatprep.subr.msk.bf16.mxu0 %vm311_vm3, %v850_v59  ;;  %v855_v63 = vsel %vm311_vm3, %v849_v58, 0 }
  0xa7   : > { %1576 = vmatmul.mubr.msk.bf16.vlgmr.msra.gmra.mxu0 %vm307_vm5, %v1574_v61  ;;  %1579 = vmatmul.mubr.msk.bf16.vlgmr.msra.gmra.mxu1 %vm307_vm5, %v1577_v62 }
  0xa8   : > { %875 = vmatpush1.bf16.msra.mxu0 %v855_v63  ;;  %892 = vmatprep.mubr.bf16.mxu0 %v1642_v2 }
  0xa9   : > { %977 = vmatprep.mubr.bf16.mxu1 %v1642_v2 }
  0xaf   : > { %1584 = vmatmul.mubr.msk.bf16.vlgmr.msra.gmra.mxu0 %vm307_vm5, %v1582_v1 }
  0xb0   : > { %1027 = vmatprep.mubr.bf16.mxu0 %v1642_v2 }
 0x14f   : > { %v352_v3 = vpop.f32.mrf.mxu0  ;;  %v402_v4 = vpop.f32.mrf.mxu1 }
 0x150   : > { %v403_v28 = vadd.f32 %v402_v4, %v352_v3  ;;  %v907_v4 = vpop.permute.xlu0 %906 }
 0x151   : > { %v354_v7 = vpop.f32.mrf.mxu0  ;;  %v404_v11 = vpop.f32.mrf.mxu1 }
 0x152   : > { %v405_v32 = vadd.f32 %v404_v11, %v354_v7 }
 0x153   : > { %v356_v12 = vpop.f32.mrf.mxu0  ;;  %v406_v13 = vpop.f32.mrf.mxu1 }
 0x155   : > { %v357_v18 = vpop.f32.mrf.mxu0  ;;  %v407_v22 = vpop.f32.mrf.mxu1 }
 0x157   : > { %v473_v5 = vpop.f32.mrf.mxu0  ;;  %v546_v23 = vpop.f32.mrf.mxu1 }
 0x158   : > { %v480_v33 = vadd.f32 %v473_v5, %v403_v28 }
 0x159   : > { %v475_v24 = vpop.f32.mrf.mxu0  ;;  %v548_v25 = vpop.f32.mrf.mxu1 }
 0x15a   : > { %v481_v9 = vadd.f32 %v475_v24, %v405_v32  ;;  %v553_v39 = vadd.f32 %v546_v23, %v480_v33 }
 0x15b   : > { %v477_v26 = vpop.f32.mrf.mxu0  ;;  %v550_v27 = vpop.f32.mrf.mxu1 }
 0x15c   : > { %v554_v43 = vadd.f32 %v548_v25, %v481_v9  ;;  %v1476_v26 = vld [vmem:[%s2106_s5] sm:$0xf] }
 0x15d   : > { %v478_v29 = vpop.f32.mrf.mxu0  ;;  %v551_v31 = vpop.f32.mrf.mxu1 }
 0x15f   : > { %v602_v35 = vpop.f32.mrf.mxu0  ;;  %v675_v36 = vpop.f32.mrf.mxu1 }
 0x160   : > { %v609_v44 = vadd.f32 %v602_v35, %v553_v39 }
 0x161   : > { %v604_v37 = vpop.f32.mrf.mxu0  ;;  %v677_v38 = vpop.f32.mrf.mxu1 }
 0x162   : > { %v610_v49 = vadd.f32 %v604_v37, %v554_v43  ;;  %v682_v53 = vadd.f32 %v675_v36, %v609_v44 }
 0x163   : > { %v606_v10 = vpop.f32.mrf.mxu0  ;;  %v679_v42 = vpop.f32.mrf.mxu1 }
 0x164   : > { %v683_v56 = vadd.f32 %v677_v38, %v610_v49 }
 0x165   : > { %v607_v47 = vpop.f32.mrf.mxu0  ;;  %v680_v48 = vpop.f32.mrf.mxu1 }
 0x167   : > { %v748_v50 = vpop.f32.mrf.mxu0  ;;  %v821_v51 = vpop.f32.mrf.mxu1 }
 0x168   : > { %v755_v57 = vadd.f32 %v748_v50, %v682_v53 }
 0x169   : > { %v750_v54 = vpop.f32.mrf.mxu0  ;;  %v823_v55 = vpop.f32.mrf.mxu1 }
 0x16a   : > { %v756_v61 = vadd.f32 %v750_v54, %v683_v56  ;;  %v828_v1 = vadd.f32 %v821_v51, %v755_v57 }
 0x16b   : > { %v752_v58 = vpop.f32.mrf.mxu0  ;;  %v825_v59 = vpop.f32.mrf.mxu1 }
 0x16c   : > { %v829_v7 = vadd.f32 %v823_v55, %v756_v61  ;;  %v921_v55 = vld [vmem:[%s2105_s4] sm:$0x3] }
 0x16d   : > { %v753_v62 = vpop.f32.mrf.mxu0  ;;  %v826_v63 = vpop.f32.mrf.mxu1 }
 0x16f   : > { %v894_v3 = vpop.f32.mrf.mxu0 }
 0x170   : > { %v901_v11 = vadd.f32 %v894_v3, %v828_v1  ;;  %v1590_v3 = vld [vmem:[%s2105_s4 + $0x4] sm:$0x3] }
 0x171   : > { %v896_v12 = vpop.f32.mrf.mxu0 }
 0x172   : > { %v909_v13 = vadd.f32 %v907_v4, %v901_v11  ;;  %v902_v18 = vadd.f32 %v896_v12, %v829_v7 }
 0x173   : > { %v898_v22 = vpop.f32.mrf.mxu0 }
 0x174   : > { %v1940_v5 = vmax.f32 %v909_v13, 0.0  ;;  %v910_v23 = vadd.f32 %v907_v4, %v902_v18 }
 0x175   : > { %v899_v24 = vpop.f32.mrf.mxu0 }
 0x176   : > { %913 = vrot.lane.b32.xlu0 %v1940_v5, %s1640_s28  ;;  %924 = vrot.lane.b32.xlu1 %v1940_v5, %s1641_s29  ;;  %v1946_v25 = vmax.f32 %v910_v23, 0.0  ;;  %v1166_v59 = vpack.c.bf16 %v1940_v5, %v1940_v5  ;;  %v1593_v23 = vld [vmem:[%s2105_s4 + $0x6] sm:$0x3] }
 0x178   : > { %v1167_v1 = vpack.c.bf16 %v1946_v25, %v1946_v25 }
 0x17a   : > { %1036 = vrot.lane.b32.xlu0 %v1940_v5, %s1643_s30  ;;  %926 = vrot.lane.b32.xlu1 %v1946_v25, %s1641_s29  ;;  %s253_s29 = scalar_lea.vmem %s2107_s6, %s1554_s24 }
 0x17e   : > { %1100 = vrot.lane.b32.xlu0 %v1940_v5, %s1644_s7  ;;  %915 = vrot.lane.b32.xlu1 %v1946_v25, %s1640_s28 }
 0x182   : > { %1220 = vrot.lane.b32.xlu0 %v1940_v5, %s1645_s8  ;;  %1038 = vrot.lane.b32.xlu1 %v1946_v25, %s1643_s30 }
 0x186   : > { %1284 = vrot.lane.b32.xlu0 %v1940_v5, %s1646_s9  ;;  %1102 = vrot.lane.b32.xlu1 %v1946_v25, %s1644_s7 }
 0x18a   : > { %1348 = vrot.lane.b32.xlu0 %v1940_v5, %s1647_s10  ;;  %1222 = vrot.lane.b32.xlu1 %v1946_v25, %s1645_s8 }
 0x18e   : > { %1412 = vrot.lane.b32.xlu0 %v1940_v5, %s1648_s11  ;;  %1286 = vrot.lane.b32.xlu1 %v1946_v25, %s1646_s9  ;;  %v1172_v5 = vsel %vm311_vm3, %v1166_v59, 0 }
 0x192   : > { %1479 = vperm.xlu0 %1630, %v1476_v26   ;;  %1350 = vrot.lane.b32.xlu1 %v1946_v25, %s1647_s10 }
 0x196   : > { %1414 = vrot.lane.b32.xlu1 %v1946_v25, %s1648_s11 }
 0x1e8   : > { %v914_v27 = vpop.permute.xlu0 %913  ;;  %v925_v28 = vpop.permute.xlu1 %924 }
 0x1ec   : > { %v1037_v29 = vpop.permute.xlu0 %1036  ;;  %v927_v31 = vpop.permute.xlu1 %926 }
 0x1ed   : > { %v928_v32 = vsel %vm290_vm1, %v925_v28, %v927_v31  ;;  %v929_v33 = vsel %vm290_vm1, %v927_v31, %v925_v28 }
 0x1ee   : > { %v930_v35 = vmul.f32 %v929_v33, %v1767_v15  ;;  %v931_v36 = vmul.f32 %v928_v32, %v1770_v16  ;;  %v1585_v16 = vld [vmem:[%s2105_s4 + $0x2] sm:$0x3]  ;;  %v1596_v32 = vld [vmem:[%s2105_s4 + $0x8] sm:$0x3] }
 0x1f0   : > { %v934_v9 = vpack.c.bf16 %v930_v35, %v930_v35  ;;  %v935_v37 = vpack.c.bf16 %v931_v36, %v931_v36  ;;  %v1101_v38 = vpop.permute.xlu0 %1100  ;;  %v916_v39 = vpop.permute.xlu1 %915 }
 0x1f1   : > { %v917_v10 = vsel %vm270_vm0, %v914_v27, %v916_v39  ;;  %v918_v42 = vsel %vm270_vm0, %v916_v39, %v914_v27  ;;  %v1599_v39 = vld [vmem:[%s2105_s4 + $0xa] sm:$0x3] }
 0x1f2   : > { %v919_v43 = vmul.f32 %v918_v42, %v1764_v14  ;;  %v920_v44 = vmul.f32 %v917_v10, %v1773_v17  ;;  %1586 = vmatprep.subr.msk.bf16.mxu1 %vm311_vm3, %v935_v37  ;;  %v940_v15 = vsel %vm311_vm3, %v934_v9, 0 }
 0x1f3   : > { %960 = vmatpush1.bf16.msra.mxu1 %v940_v15 }
 0x1f4   : > { %v922_v47 = vpack.c.bf16 %v919_v43, %v919_v43  ;;  %v923_v48 = vpack.c.bf16 %v920_v44, %v920_v44  ;;  %v1039_v49 = vpop.permute.xlu1 %1038  ;;  %v1221_v51 = vpop.permute.xlu0 %1220 }
 0x1f5   : > { %v1040_v50 = vsel %vm413_vm2, %v1037_v29, %v1039_v49  ;;  %v1041_v14 = vsel %vm413_vm2, %v1039_v49, %v1037_v29 }
 0x1f6   : > { %v1042_v17 = vmul.f32 %v1041_v14, %v1777_v20  ;;  %v1043_v53 = vmul.f32 %v1040_v50, %v1780_v21  ;;  %1587 = vmatmul.mubr.msk.bf16.vlgmr.msra.gmra.mxu1 %vm307_vm5, %v1585_v16  ;;  %1588 = vmatprep.subr.msk.bf16.mxu0 %vm311_vm3, %v923_v48  ;;  %v990_v54 = vsel %vm311_vm3, %v922_v47, 0  ;;  %v1602_v48 = vld [vmem:[%s2105_s4 + $0xc] sm:$0x3]  ;;  %v1608_v50 = vld [vmem:[%s2105_s4 + $0x10] sm:$0x3] }
 0x1f7   : > { %1010 = vmatpush1.bf16.msra.mxu0 %v990_v54  ;;  %1089 = vmatprep.mubr.bf16.mxu1 %v1642_v2 }
 0x1f8   : > { %v1046_v56 = vpack.c.bf16 %v1042_v17, %v1042_v17  ;;  %v1047_v57 = vpack.c.bf16 %v1043_v53, %v1043_v53  ;;  %v1103_v58 = vpop.permute.xlu1 %1102  ;;  %v1285_v4 = vpop.permute.xlu0 %1284 }
 0x1f9   : > { %v1104_v20 = vsel %vm486_vm4, %v1101_v38, %v1103_v58  ;;  %v1105_v21 = vsel %vm486_vm4, %v1103_v58, %v1101_v38 }
 0x1fa   : > { %v1106_v61 = vmul.f32 %v1105_v21, %v1802_v40  ;;  %v1107_v62 = vmul.f32 %v1104_v20, %v1805_v41  ;;  %1589 = vmatmul.mubr.msk.bf16.vlgmr.msra.gmra.mxu0 %vm307_vm5, %v921_v55  ;;  %1591 = vmatprep.subr.msk.bf16.mxu1 %vm311_vm3, %v1047_v57  ;;  %v1052_v63 = vsel %vm311_vm3, %v1046_v56, 0 }
 0x1fb   : > { %1072 = vmatpush1.bf16.msra.mxu1 %v1052_v63  ;;  %1153 = vmatprep.mubr.bf16.mxu0 %v1642_v2 }
 0x1fc   : > { %v1110_v40 = vpack.c.bf16 %v1106_v61, %v1106_v61  ;;  %v1111_v7 = vpack.c.bf16 %v1107_v62, %v1107_v62  ;;  %v1223_v41 = vpop.permute.xlu1 %1222  ;;  %1597 = vmatprep.subr.msk.bf16.mxu1 %vm311_vm3, %v1167_v1  ;;  %v1349_v27 = vpop.permute.xlu0 %1348 }
 0x1fd   : > { %v1224_v11 = vsel %vm615_vm6, %v1221_v51, %v1223_v41  ;;  %v1225_v12 = vsel %vm615_vm6, %v1223_v41, %v1221_v51 }
 0x1fe   : > { %v1226_v13 = vmul.f32 %v1224_v11, %v1821_v52  ;;  %v1227_v18 = vmul.f32 %v1225_v12, %v1836_v60  ;;  %1592 = vmatmul.mubr.msk.bf16.vlgmr.msra.gmra.mxu1 %vm307_vm5, %v1590_v3  ;;  %1594 = vmatprep.subr.msk.bf16.mxu0 %vm311_vm3, %v1111_v7  ;;  %v1116_v22 = vsel %vm311_vm3, %v1110_v40, 0 }
 0x1ff   : > { %1136 = vmatpush1.bf16.msra.mxu0 %v1116_v22  ;;  %1192 = vmatpush1.bf16.msra.mxu1 %v1172_v5 }
 0x200   : > { %v1230_v24 = vpack.c.bf16 %v1226_v13, %v1226_v13  ;;  %v1231_v25 = vpack.c.bf16 %v1227_v18, %v1227_v18  ;;  %v1287_v26 = vpop.permute.xlu1 %1286  ;;  %1209 = vmatprep.mubr.bf16.mxu1 %v1642_v2  ;;  %v1413_v10 = vpop.permute.xlu0 %1412 }
 0x201   : > { %v1288_v52 = vsel %vm688_vm7, %v1285_v4, %v1287_v26  ;;  %v1289_v60 = vsel %vm688_vm7, %v1287_v26, %v1285_v4 }
 0x202   : > { %v1290_v28 = vmul.f32 %v1288_v52, %v1849_v8  ;;  %v1291_v29 = vmul.f32 %v1289_v60, %v1858_v19  ;;  %1595 = vmatmul.mubr.msk.bf16.vlgmr.msra.gmra.mxu0 %vm307_vm5, %v1593_v23  ;;  %1600 = vmatprep.subr.msk.bf16.mxu0 %vm311_vm3, %v1231_v25  ;;  %v1236_v31 = vsel %vm311_vm3, %v1230_v24, 0 }
 0x203   : > { %1256 = vmatpush1.bf16.msra.mxu0 %v1236_v31  ;;  %1273 = vmatprep.mubr.bf16.mxu0 %v1642_v2 }
 0x204   : > { %v1294_v33 = vpack.c.bf16 %v1290_v28, %v1290_v28  ;;  %v1295_v35 = vpack.c.bf16 %v1291_v29, %v1291_v29  ;;  %v1351_v36 = vpop.permute.xlu1 %1350 }
 0x205   : > { %v1352_v8 = vsel %vm761_vm8, %v1349_v27, %v1351_v36  ;;  %v1353_v19 = vsel %vm761_vm8, %v1351_v36, %v1349_v27 }
 0x206   : > { %v1354_v9 = vmul.f32 %v1352_v8, %v1873_v30  ;;  %v1355_v37 = vmul.f32 %v1353_v19, %v1881_v34  ;;  %1598 = vmatmul.mubr.msk.bf16.vlgmr.msra.gmra.mxu1 %vm307_vm5, %v1596_v32  ;;  %1603 = vmatprep.subr.msk.bf16.mxu1 %vm311_vm3, %v1295_v35  ;;  %v1300_v38 = vsel %vm311_vm3, %v1294_v33, 0 }
 0x207   : > { %1320 = vmatpush1.bf16.msra.mxu1 %v1300_v38  ;;  %1337 = vmatprep.mubr.bf16.mxu1 %v1642_v2 }
 0x208   : > { %v1358_v42 = vpack.c.bf16 %v1354_v9, %v1354_v9  ;;  %v1359_v43 = vpack.c.bf16 %v1355_v37, %v1355_v37  ;;  %v1415_v44 = vpop.permute.xlu1 %1414 }
 0x209   : > { %v1416_v30 = vsel %vm834_vm9, %v1413_v10, %v1415_v44  ;;  %v1417_v34 = vsel %vm834_vm9, %v1415_v44, %v1413_v10 }
 0x20a   : > { %v1418_v15 = vmul.f32 %v1903_v45, %v1416_v30  ;;  %v1419_v16 = vmul.f32 %v1908_v46, %v1417_v34  ;;  %1601 = vmatmul.mubr.msk.bf16.vlgmr.msra.gmra.mxu0 %vm307_vm5, %v1599_v39  ;;  %1606 = vmatprep.subr.msk.bf16.mxu0 %vm311_vm3, %v1359_v43  ;;  %v1364_v47 = vsel %vm311_vm3, %v1358_v42, 0  ;;  %v1605_v46 = vld [vmem:[%s2105_s4 + $0xe] sm:$0x3] }
 0x20b   : > { %1384 = vmatpush1.bf16.msra.mxu0 %v1364_v47  ;;  %1401 = vmatprep.mubr.bf16.mxu0 %v1642_v2 }
 0x20c   : > { %v1422_v49 = vpack.c.bf16 %v1418_v15, %v1418_v15  ;;  %v1423_v6 = vpack.c.bf16 %v1419_v16, %v1419_v16 }
 0x20d   : > { %v1480_v37 = vpop.permute.xlu0 %1479 }
 0x20e   : > { %1604 = vmatmul.mubr.msk.bf16.vlgmr.msra.gmra.mxu1 %vm307_vm5, %v1602_v48  ;;  %1609 = vmatprep.subr.msk.bf16.mxu1 %vm311_vm3, %v1423_v6  ;;  %v1428_v45 = vsel %vm311_vm3, %v1422_v49, 0 }
 0x20f   : > { %1448 = vmatpush1.bf16.msra.mxu1 %v1428_v45  ;;  %1465 = vmatprep.mubr.bf16.mxu1 %v1642_v2 }
 0x212   : > { %1607 = vmatmul.mubr.msk.bf16.vlgmr.msra.gmra.mxu0 %vm307_vm5, %v1605_v46 }
 0x216   : > { %1610 = vmatmul.mubr.msk.bf16.vlgmr.msra.gmra.mxu1 %vm307_vm5, %v1608_v50 }
 0x2b6   : > { %v979_v14 = vpop.f32.mrf.mxu1 }
 0x2b8   : > { %v981_v51 = vpop.f32.mrf.mxu1 }
 0x2ba   : > { %v983_v17 = vpop.f32.mrf.mxu1  ;;  %v1029_v53 = vpop.f32.mrf.mxu0 }
 0x2bb   : > { %v1030_v4 = vadd.f32 %v1029_v53, %v979_v14 }
 0x2bc   : > { %v984_v54 = vpop.f32.mrf.mxu1  ;;  %v1031_v55 = vpop.f32.mrf.mxu0 }
 0x2bd   : > { %v1032_v41 = vadd.f32 %v1031_v55, %v981_v51 }
 0x2be   : > { %v1033_v56 = vpop.f32.mrf.mxu0  ;;  %v1091_v57 = vpop.f32.mrf.mxu1 }
 0x2bf   : > { %v1098_v11 = vadd.f32 %v1091_v57, %v1030_v4 }
 0x2c0   : > { %v1034_v58 = vpop.f32.mrf.mxu0  ;;  %v1093_v20 = vpop.f32.mrf.mxu1 }
 0x2c1   : > { %v1099_v18 = vadd.f32 %v1093_v20, %v1032_v41 }
 0x2c2   : > { %v1095_v21 = vpop.f32.mrf.mxu1  ;;  %v1155_v2 = vpop.f32.mrf.mxu0 }
 0x2c3   : > { %v1162_v22 = vadd.f32 %v1155_v2, %v1098_v11 }
 0x2c4   : > { %v1096_v59 = vpop.f32.mrf.mxu1  ;;  %v1157_v61 = vpop.f32.mrf.mxu0 }
 0x2c5   : > { %v1163_v24 = vadd.f32 %v1157_v61, %v1099_v18 }
 0x2c6   : > { %v1159_v62 = vpop.f32.mrf.mxu0  ;;  %v1211_v63 = vpop.f32.mrf.mxu1 }
 0x2c7   : > { %v1218_v25 = vadd.f32 %v1211_v63, %v1162_v22 }
 0x2c8   : > { %v1160_v1 = vpop.f32.mrf.mxu0  ;;  %v1213_v3 = vpop.f32.mrf.mxu1 }
 0x2c9   : > { %v1219_v60 = vadd.f32 %v1213_v3, %v1163_v24 }
 0x2ca   : > { %v1215_v40 = vpop.f32.mrf.mxu1  ;;  %v1275_v7 = vpop.f32.mrf.mxu0 }
 0x2cb   : > { %v1282_v27 = vadd.f32 %v1275_v7, %v1218_v25 }
 0x2cc   : > { %v1216_v12 = vpop.f32.mrf.mxu1  ;;  %v1277_v13 = vpop.f32.mrf.mxu0 }
 0x2cd   : > { %v1283_v31 = vadd.f32 %v1277_v13, %v1219_v60 }
 0x2ce   : > { %v1279_v5 = vpop.f32.mrf.mxu0  ;;  %v1339_v23 = vpop.f32.mrf.mxu1 }
 0x2cf   : > { %v1346_v32 = vadd.f32 %v1339_v23, %v1282_v27 }
 0x2d0   : > { %v1280_v26 = vpop.f32.mrf.mxu0  ;;  %v1341_v52 = vpop.f32.mrf.mxu1 }
 0x2d1   : > { %v1347_v36 = vadd.f32 %v1341_v52, %v1283_v31 }
 0x2d2   : > { %v1343_v28 = vpop.f32.mrf.mxu1  ;;  %v1403_v29 = vpop.f32.mrf.mxu0 }
 0x2d3   : > { %v1410_v8 = vadd.f32 %v1403_v29, %v1346_v32 }
 0x2d4   : > { %v1344_v33 = vpop.f32.mrf.mxu1  ;;  %v1405_v35 = vpop.f32.mrf.mxu0 }
 0x2d5   : > { %v1411_v38 = vadd.f32 %v1405_v35, %v1347_v36 }
 0x2d6   : > { %v1467_v19 = vpop.f32.mrf.mxu1  ;;  %v1407_v9 = vpop.f32.mrf.mxu0 }
 0x2d7   : > { %v1474_v39 = vadd.f32 %v1467_v19, %v1410_v8 }
 0x2d8   : > { %v1469_v10 = vpop.f32.mrf.mxu1  ;;  %v1408_v42 = vpop.f32.mrf.mxu0 }
 0x2d9   : > { %v1482_v43 = vadd.f32 %v1480_v37, %v1474_v39  ;;  %v1475_v44 = vadd.f32 %v1469_v10, %v1411_v38 }
 0x2da   : > { %v1471_v30 = vpop.f32.mrf.mxu1 }
 0x2db   : > { %v1483_v34 = vadd.f32 %v1480_v37, %v1475_v44  ;;  %v1484_v16 = vmax.f32 %v1482_v43, 0.0 }
 0x2dc   : > { %v1472_v15 = vpop.f32.mrf.mxu1 }
 0x2dd   : > { %v1485_v47 = vmax.f32 %v1483_v34, 0.0 }
 0x2df   : > { %v1488_v48 = vcombine.low %v1484_v16, %v1485_v47 }
 0x2e1   : > { %v1490_v49 = vadd.f32 %v1488_v48, %v1700_v0 }
 0x2e3   : > { %1491 = vst [vmem:[%s253_s29] sm:$0xff] %v1490_v49 }
 0x2e4 PF: > { %s16_s21 = sadd.s32 1, %s1638_s21  }
 0x2e5   : > { %p13_p4 = scmp.ge.s32.totalorder %s16_s21, 4  }
 0x2e7   :  { %15 = sbr.rel (!%p13_p4) target bundleno = 1 (0x1), region = 90 }

</bundles_post_ra>
